<compile_context>
chip_gen: v6e
topology: v6e:2x2x1
jax: 0.10.0
libtpu: 0.0.40
codegen_flags: <defaults>
</compile_context>

<pallas_src>
import math

import jax
import jax.numpy as jnp
from jax.experimental import pallas as pl
from jax.experimental.pallas import tpu as pltpu

LANES = 128            # vreg lane width (last dim)
SMALL_BYTES = 1 << 20  # below this, a fused XLA elementwise beats pallas_call overhead


def _rank_loss_scalar_delta_kernel(d_ref, y1_ref, y2_ref, o_ref):
    # loss = max(Y2 - Y1 + delta, 0); delta is an SMEM scalar (vreg splat is free).
    d = d_ref[0]
    y1 = y1_ref[...].astype(jnp.float32)
    y2 = y2_ref[...].astype(jnp.float32)
    o_ref[...] = jnp.maximum(y2 - y1 + d, 0.0).astype(o_ref.dtype)


def _rank_loss_tensor_delta_kernel(y1_ref, y2_ref, d_ref, o_ref):
    y1 = y1_ref[...].astype(jnp.float32)
    y2 = y2_ref[...].astype(jnp.float32)
    d = d_ref[...].astype(jnp.float32)
    o_ref[...] = jnp.maximum(y2 - y1 + d, 0.0).astype(o_ref.dtype)


def _ceil_to(x, m):
    return -(-x // m) * m


def _sublane_align(*dtypes):
    # Minimum second-to-last-dim tile per dtype width: f32->8, bf16/f16->16, int8/fp8->32.
    worst = 8
    for dt in dtypes:
        worst = max(worst, {4: 8, 2: 16, 1: 32}.get(jnp.dtype(dt).itemsize, 8))
    return worst


def _vmem_budget_bytes():
    # Leave headroom under the scoped-VMEM default (16 MiB v5e, 32 MiB v6e/v7x).
    try:
        kind = jax.devices()[0].device_kind.lower()
    except Exception:
        kind = ""
    return (12 << 20) if "v5" in kind else (24 << 20)


def _pack_rows(flat, n, rows):
    pad = rows * LANES - n
    if pad:
        flat = jnp.pad(flat, (0, pad))
    return flat.reshape(rows, LANES)


def rank_loss1_forward(Y1, Y2, delta, *, use_pallas=None):
    """clamp(Y2 - Y1 + delta, min=0). `delta` may be a scalar or a broadcastable tensor."""
    Y1 = jnp.asarray(Y1)
    Y2 = jnp.asarray(Y2)
    delta = jnp.asarray(delta)
    scalar_delta = delta.size == 1

    in_dtype = jnp.promote_types(Y1.dtype, Y2.dtype)
    if not jnp.issubdtype(in_dtype, jnp.floating):
        in_dtype = jnp.float32

    if scalar_delta:
        d_dtype = None
        out_dtype = in_dtype
        out_shape = jnp.broadcast_shapes(Y1.shape, Y2.shape)
    else:
        d_dtype = delta.dtype if jnp.issubdtype(delta.dtype, jnp.floating) else jnp.float32
        out_dtype = jnp.promote_types(in_dtype, d_dtype)
        out_shape = jnp.broadcast_shapes(Y1.shape, Y2.shape, delta.shape)

    n = math.prod(out_shape)
    if n == 0:
        return jnp.zeros(out_shape, out_dtype)

    in_isz = jnp.dtype(in_dtype).itemsize
    out_isz = jnp.dtype(out_dtype).itemsize

    if use_pallas is None:
        use_pallas = (2 * in_isz + out_isz) * n >= SMALL_BYTES
    if not use_pallas:
        # Small-input fast path: let XLA fuse the elementwise op (no pallas_call overhead).
        return jnp.maximum(
            Y2.astype(out_dtype) - Y1.astype(out_dtype) + delta.astype(out_dtype), 0
        ).astype(out_dtype)

    # ---- Pallas path: lane-dense (rows, 128) slab, masked partial last block. ----
    if scalar_delta:
        align = _sublane_align(in_dtype, out_dtype)
        stream_isz = 2 * in_isz + out_isz            # HBM/VMEM bytes per element
    else:
        align = _sublane_align(in_dtype, out_dtype, d_dtype)
        stream_isz = 2 * in_isz + out_isz + jnp.dtype(d_dtype).itemsize

    rows = _ceil_to(pl.cdiv(n, LANES), align)        # pad only a tiny tail (< align*128 elems)
    pad = rows * LANES - n

    y1 = _pack_rows(jnp.broadcast_to(Y1, out_shape).astype(in_dtype).reshape(-1), n, rows)
    y2 = _pack_rows(jnp.broadcast_to(Y2, out_shape).astype(in_dtype).reshape(-1), n, rows)

    # Rows per grid step from the double-buffered VMEM budget (~4K-8K rows for f32).
    tm = _vmem_budget_bytes() // (2 * stream_isz * LANES)
    tm = max(256, (tm // 256) * 256)
    tm = min(tm, rows)

    grid = (pl.cdiv(rows, tm),)                      # last block masked, no row padding to tm
    vspec = pl.BlockSpec((tm, LANES), lambda i: (i, 0))
    out_sds = jax.ShapeDtypeStruct((rows, LANES), out_dtype)
    params = pltpu.CompilerParams(dimension_semantics=("parallel",))
    cost = pl.CostEstimate(flops=2 * n, transcendentals=0,
                           bytes_accessed=rows * LANES * stream_isz)

    if scalar_delta:
        d_smem = delta.astype(jnp.float32).reshape(1)
        out = pl.pallas_call(
            _rank_loss_scalar_delta_kernel,
            out_shape=out_sds,
            grid=grid,
            in_specs=[pl.BlockSpec(memory_space=pltpu.MemorySpace.SMEM), vspec, vspec],
            out_specs=vspec,
            compiler_params=params,
            cost_estimate=cost,
        )(d_smem, y1, y2)
    else:
        d = _pack_rows(jnp.broadcast_to(delta, out_shape).astype(d_dtype).reshape(-1), n, rows)
        out = pl.pallas_call(
            _rank_loss_tensor_delta_kernel,
            out_shape=out_sds,
            grid=grid,
            in_specs=[vspec, vspec, vspec],
            out_specs=vspec,
            compiler_params=params,
            cost_estimate=cost,
        )(y1, y2, d)

    if pad:
        return out.reshape(-1)[:n].reshape(out_shape)
    return out.reshape(out_shape)


if __name__ == "__main__":
    key = jax.random.PRNGKey(0)
    k1, k2, k3, k4 = jax.random.split(key, 4)

    # Primary test: small shape consistent with the module, scalar margin.
    shape = (2, 4, 16, 16)
    Y1 = jax.random.normal(k1, shape, jnp.float32)
    Y2 = jax.random.normal(k2, shape, jnp.float32)
    delta = jnp.float32(0.5)

    fwd = jax.jit(lambda a, b, d: rank_loss1_forward(a, b, d, use_pallas=True))
    out = jax.block_until_ready(fwd(Y1, Y2, delta))

    ref = jnp.maximum(Y2 - Y1 + delta, 0.0)
    assert out.shape == shape, out.shape
    assert out.dtype == Y1.dtype
    assert bool(jnp.all(jnp.isfinite(out)))
    assert bool(jnp.all(out >= 0.0))
    assert bool(jnp.allclose(out, ref, atol=1e-6, rtol=1e-6))

    # Secondary test: ragged size (n % 128 != 0) + tensor delta path.
    shape2 = (3, 37, 19)
    A = jax.random.normal(k3, shape2, jnp.float32)
    B = jax.random.normal(k4, shape2, jnp.float32)
    D = jnp.full(shape2, 0.25, jnp.float32)
    out2 = jax.block_until_ready(fwd(A, B, D))
    ref2 = jnp.maximum(B - A + D, 0.0)
    assert out2.shape == shape2
    assert bool(jnp.allclose(out2, ref2, atol=1e-6, rtol=1e-6))

    print("KERNEL_OK")
</pallas_src>

<mosaic_0001>
module attributes {stable_mosaic.version = 11 : i64} {
  func.func @_rank_loss_scalar_delta_kernel(%arg0: i32, %arg1: memref<1xf32, #tpu.memory_space<smem>>, %arg2: memref<16x128xf32, #tpu.memory_space<vmem>>, %arg3: memref<16x128xf32, #tpu.memory_space<vmem>>, %arg4: memref<16x128xf32, #tpu.memory_space<vmem>>) attributes {dimension_semantics = [#tpu.dimension_semantics<parallel>], iteration_bounds = array<i64: 1>, scalar_prefetch = 0 : i64, scratch_operands = 0 : i64, tpu.core_type = #tpu.core_type<tc>, window_params = [{transform_indices = @transform_0, window_bounds = array<i64: 1>}, {transform_indices = @transform_1, window_bounds = array<i64: 16, 128>}, {transform_indices = @transform_2, window_bounds = array<i64: 16, 128>}, {transform_indices = @transform_3, window_bounds = array<i64: 16, 128>}]} {
    %c0 = arith.constant 0 : index
    %0 = memref.load %arg1[%c0] : memref<1xf32, #tpu.memory_space<smem>>
    %c0_0 = arith.constant 0 : index
    %c0_1 = arith.constant 0 : index
    %1 = vector.load %arg2[%c0_0, %c0_1] : memref<16x128xf32, #tpu.memory_space<vmem>>, vector<16x128xf32>
    %c0_2 = arith.constant 0 : index
    %c0_3 = arith.constant 0 : index
    %2 = vector.load %arg3[%c0_2, %c0_3] : memref<16x128xf32, #tpu.memory_space<vmem>>, vector<16x128xf32>
    %3 = arith.subf %2, %1 : vector<16x128xf32>
    %4 = vector.broadcast %0 : f32 to vector<16x128xf32>
    %5 = arith.addf %3, %4 : vector<16x128xf32>
    %cst = arith.constant 0.000000e+00 : f32
    %6 = vector.broadcast %cst : f32 to vector<16x128xf32>
    %7 = arith.maximumf %5, %6 : vector<16x128xf32>
    %c0_4 = arith.constant 0 : index
    %c0_5 = arith.constant 0 : index
    %8 = vector.load %arg4[%c0_4, %c0_5] : memref<16x128xf32, #tpu.memory_space<vmem>>, vector<16x128xf32>
    tpu.vector_store %arg4[%c0_4, %c0_5], %7 {strides = array<i32>} : memref<16x128xf32, #tpu.memory_space<vmem>>, vector<16x128xf32>,
    return
  }
  func.func @transform_0(%arg0: i32) -> i32 {
    %c0_i32 = arith.constant 0 : i32
    %c0_i32_0 = arith.constant 0 : i32
    return %c0_i32 : i32
  }
  func.func @transform_1(%arg0: i32) -> (i32, i32) {
    %c0_i32 = arith.constant 0 : i32
    %c0_i32_0 = arith.constant 0 : i32
    return %arg0, %c0_i32 : i32, i32
  }
  func.func @transform_2(%arg0: i32) -> (i32, i32) {
    %c0_i32 = arith.constant 0 : i32
    %c0_i32_0 = arith.constant 0 : i32
    return %arg0, %c0_i32 : i32, i32
  }
  func.func @transform_3(%arg0: i32) -> (i32, i32) {
    %c0_i32 = arith.constant 0 : i32
    %c0_i32_0 = arith.constant 0 : i32
    return %arg0, %c0_i32 : i32, i32
  }
}

</mosaic_0001>

<bundles_post_ra>
// kernel: _lambda_.1
= control target key start
LH: loop header
LB: loop body
LE: loop exit
PB: predicated region body
PF: predicated region fallthrough
CT: control target
= control target key end

     0   :  { %s74_s0 = inlined_call_operand.<no memory space> [shape: f32[1], index: 0, kind: input, shape index: {}]   ;;  %s75_s1 = inlined_call_operand.vmem [shape: f32[16,128], index: 1, kind: input, shape index: {}]   ;;  %s76_s2 = inlined_call_operand.vmem [shape: f32[16,128], index: 2, kind: input, shape index: {}]   ;;  %s77_s3 = inlined_call_operand.vmem [shape: f32[16,128], index: 3, kind: output, shape index: {}]  }
   0x1   :  { %v16_v0 = vld [vmem:[%s75_s1] sm:$0xff]  ;;  %v22_v2 = vstv %s74_s0  ;;  %v17_v3 = vld [vmem:[%s75_s1 + $0x8] sm:$0xff] }
   0x2   :  { %v18_v1 = vld [vmem:[%s76_s2] sm:$0xff]  ;;  %v19_v5 = vld [vmem:[%s76_s2 + $0x8] sm:$0xff] }
   0x3   :  { %v20_v4 = vsub.f32 %v18_v1, %v16_v0  ;;  %v21_v6 = vsub.f32 %v19_v5, %v17_v3 }
   0x5   :  { %v23_v7 = vadd.f32 %v22_v2, %v20_v4  ;;  %v24_v8 = vadd.f32 %v22_v2, %v21_v6 }
   0x7   :  { %v25_v9 = vmax.f32 %v23_v7, 0.0  ;;  %v26_v10 = vmax.f32 %v24_v8, 0.0 }
   0x9   :  { %27 = vst [vmem:[%s77_s3] sm:$0xff] %v25_v9  ;;  %28 = vst [vmem:[%s77_s3 + $0x8] sm:$0xff] %v26_v10 }

</bundles_post_ra>
